<compile_context>
chip_gen: v7x
topology: tpu7x:2x2x1
jax: 0.10.0
libtpu: 0.0.40
codegen_flags: <defaults>
</compile_context>

<pallas_src>
import functools

import jax
import jax.numpy as jnp
from jax.experimental import pallas as pl
from jax.experimental.pallas import tpu as pltpu

IN_DIM = 2            # hide_layer in the PyTorch module
H_DIM = 32            # opt.h_dim
DEFAULT_TILE_B = 4096  # safe on v5e; sweep up to 8192-16384 on v6e/v7x


def _round_up(x, m):
    return ((x + m - 1) // m) * m


def _cdiv(a, b):
    return -(-a // b)


def _choose_tiling(batch, max_tile_b):
    """Pick (tile_b, n_tiles, b_pad).

    Guarantees: tile_b is a multiple of 128; n_tiles >= 2 whenever the padded
    batch spans more than one 128-lane unit (keeps both v7x TensorCores busy);
    zero-padding is always < one tile (no dead tiles)."""
    n_units = _cdiv(max(batch, 1), 128)                  # 128-lane units of batch
    max_units = max(1, min(max_tile_b, 128 * n_units) // 128)
    if n_units == 1:
        return 128, 1, 128
    n_tiles = max(2, _cdiv(n_units, max_units))          # >= 2 tiles for dual-TC
    tile_units = _cdiv(n_units, n_tiles)                  # even-ish split
    tile_b = tile_units * 128
    n_tiles = _cdiv(n_units, tile_units)
    return tile_b, n_tiles, n_tiles * tile_b


def _mlp_kernel(xT_ref, w1_ref, b1_ref, w2_ref, b2_ref,
                w3_ref, b3_ref, w4_ref, b4_ref, o_ref):
    """Feature-major fused MLP over one batch tile.

    xT_ref     : (IN_DIM, TILE_B) f32  input, transposed (feature-major)
    w1_ref     : (H_DIM, IN_DIM)  f32
    w2/w3_ref  : (H_DIM, H_DIM)   bf16 (pre-cast in wrapper)
    w4_ref     : (H_DIM, 1)       f32  final-layer weight column
    bN_ref     : (out, 1)         f32  bias columns
    o_ref      : (1, TILE_B)      lane-dense output
    """
    xT = xT_ref[...]                                     # (IN_DIM, TILE_B)
    w1 = w1_ref[...]                                     # (H_DIM, IN_DIM)

    # Layer 1: K = 2 contraction -> broadcast FMAs on the VPU (no MXU).
    h = b1_ref[...]                                      # (H_DIM, 1) -> broadcast
    for k in range(IN_DIM):
        h = h + w1[:, k:k + 1] * xT[k:k + 1, :]          # (H_DIM, TILE_B) f32
    h = jnp.maximum(h, 0.0)

    # Hidden layers: single-pass bf16 MXU matmuls, f32 accumulation,
    # bias/ReLU kept in f32.
    h = jnp.dot(w2_ref[...], h.astype(jnp.bfloat16),
                preferred_element_type=jnp.float32) + b2_ref[...]
    h = jnp.maximum(h, 0.0)

    h = jnp.dot(w3_ref[...], h.astype(jnp.bfloat16),
                preferred_element_type=jnp.float32) + b3_ref[...]
    h = jnp.maximum(h, 0.0)

    # Final layer (out_dim = 1): VPU multiply + sublane reduce, not an M=1
    # MXU matmul.
    out = jnp.sum(w4_ref[...] * h, axis=0, keepdims=True) + b4_ref[...]
    o_ref[...] = out.astype(o_ref.dtype)                 # (1, TILE_B) lane-dense


@functools.partial(jax.jit, static_argnames=("max_tile_b",))
def discriminator_forward(x, params, max_tile_b=DEFAULT_TILE_B):
    """x: (B, IN_DIM) float32 -> (B,) float32 (matches .view(-1))."""
    w1, b1, w2, b2, w3, b3, w4, b4 = params
    B = x.shape[0]

    tile_b, n_tiles, b_pad = _choose_tiling(B, max_tile_b)

    # Feature-major input.  (Separate XLA transpose pass; acceptable while the
    # kernel is compute/overhead-bound -- see review note.)
    xT = x.T                                             # (IN_DIM, B)
    if b_pad != B:
        xT = jnp.pad(xT, ((0, 0), (0, b_pad - B)))

    # Hidden-layer weights go to the MXU as bf16 (single-pass); cast once here.
    w2_bf = w2.astype(jnp.bfloat16)
    w3_bf = w3.astype(jnp.bfloat16)
    # Final-layer weight as a column so the kernel can do a VPU/XLU reduce.
    w4_col = w4.reshape(H_DIM, 1)

    # Weights/biases: full-array blocks, constant index_map -> VMEM-resident.
    def _const_spec(shape):
        return pl.BlockSpec(shape, lambda i: (0, 0))

    in_specs = [
        pl.BlockSpec((IN_DIM, tile_b), lambda i: (0, i)),   # x tile, streamed
        _const_spec((H_DIM, IN_DIM)), _const_spec((H_DIM, 1)),
        _const_spec((H_DIM, H_DIM)), _const_spec((H_DIM, 1)),
        _const_spec((H_DIM, H_DIM)), _const_spec((H_DIM, 1)),
        _const_spec((H_DIM, 1)),     _const_spec((1, 1)),
    ]
    out_spec = pl.BlockSpec((1, tile_b), lambda i: (0, i))  # lane-dense output

    flops = 2 * b_pad * (IN_DIM * H_DIM + 2 * H_DIM * H_DIM + H_DIM)
    bytes_accessed = (4 * b_pad * (IN_DIM + 1)                       # x + out
                      + 4 * (H_DIM * IN_DIM + H_DIM + 1)             # w1, w4, b4
                      + 2 * (2 * H_DIM * H_DIM)                      # w2, w3 bf16
                      + 4 * 3 * H_DIM)                               # b1..b3

    out = pl.pallas_call(
        _mlp_kernel,
        out_shape=jax.ShapeDtypeStruct((1, b_pad), x.dtype),
        grid=(n_tiles,),
        in_specs=in_specs,
        out_specs=out_spec,
        compiler_params=pltpu.CompilerParams(
            dimension_semantics=("parallel",),       # batch tiles -> both TCs
            vmem_limit_bytes=32 * 1024 * 1024,       # v7x-safe scoped limit
        ),
        cost_estimate=pl.CostEstimate(
            flops=flops, transcendentals=0, bytes_accessed=bytes_accessed),
    )(xT, w1, b1, w2_bf, b2, w3_bf, b3, w4_col, b4)

    return out.reshape(-1)[:B]


def init_params(key):
    """PyTorch-style init: U(-1/sqrt(fan_in), +1/sqrt(fan_in)); W is (out, in)."""
    def linear(key, fan_in, fan_out):
        kw, kb = jax.random.split(key)
        bound = 1.0 / jnp.sqrt(fan_in)
        w = jax.random.uniform(kw, (fan_out, fan_in), jnp.float32, -bound, bound)
        b = jax.random.uniform(kb, (fan_out, 1), jnp.float32, -bound, bound)
        return w, b

    k1, k2, k3, k4 = jax.random.split(key, 4)
    w1, b1 = linear(k1, IN_DIM, H_DIM)
    w2, b2 = linear(k2, H_DIM, H_DIM)
    w3, b3 = linear(k3, H_DIM, H_DIM)
    w4, b4 = linear(k4, H_DIM, 1)
    return (w1, b1, w2, b2, w3, b3, w4, b4)


def reference_forward(x, params):
    """Pure-f32 reference of the original module."""
    w1, b1, w2, b2, w3, b3, w4, b4 = params
    h = jnp.maximum(x @ w1.T + b1.T, 0.0)
    h = jnp.maximum(h @ w2.T + b2.T, 0.0)
    h = jnp.maximum(h @ w3.T + b3.T, 0.0)
    return (h @ w4.T + b4.T).reshape(-1)


if __name__ == "__main__":
    key = jax.random.PRNGKey(0)
    kx, kx2, kp = jax.random.split(key, 3)
    params = init_params(kp)

    # Tolerances are loosened vs. a pure-f32 reference because the hidden-layer
    # dots run in single-pass bf16 on the MXU (expected |err| ~1e-3).
    ATOL = RTOL = 2e-2

    # Small single-tile case (B=8 padded to one 128-wide tile).
    B = 8
    x = jax.random.normal(kx, (B, IN_DIM), jnp.float32)
    out = discriminator_forward(x, params)
    jax.block_until_ready(out)
    ref = reference_forward(x, params)
    assert out.shape == (B,), out.shape
    assert jnp.allclose(out, ref, atol=ATOL, rtol=RTOL), (out, ref)

    # Multi-tile case with a ragged tail: B=300 -> 2 tiles of 256 (pad 512),
    # exercises the >=2-tile (dual-TC) path and zero-padding slice-off.
    B2 = 300
    x2 = jax.random.normal(kx2, (B2, IN_DIM), jnp.float32)
    out2 = discriminator_forward(x2, params)
    jax.block_until_ready(out2)
    ref2 = reference_forward(x2, params)
    assert out2.shape == (B2,), out2.shape
    assert jnp.allclose(out2, ref2, atol=ATOL, rtol=RTOL)

    print("KERNEL_OK")
</pallas_src>

<mosaic_0001>
module attributes {stable_mosaic.version = 11 : i64} {
  func.func @_mlp_kernel(%arg0: i32, %arg1: memref<2x128xf32, #tpu.memory_space<vmem>>, %arg2: memref<32x2xf32, #tpu.memory_space<vmem>>, %arg3: memref<32x1xf32, #tpu.memory_space<vmem>>, %arg4: memref<32x32xbf16, #tpu.memory_space<vmem>>, %arg5: memref<32x1xf32, #tpu.memory_space<vmem>>, %arg6: memref<32x32xbf16, #tpu.memory_space<vmem>>, %arg7: memref<32x1xf32, #tpu.memory_space<vmem>>, %arg8: memref<32x1xf32, #tpu.memory_space<vmem>>, %arg9: memref<1x1xf32, #tpu.memory_space<vmem>>, %arg10: memref<1x128xf32, #tpu.memory_space<vmem>>) attributes {dimension_semantics = [#tpu.dimension_semantics<parallel>], iteration_bounds = array<i64: 1>, scalar_prefetch = 0 : i64, scratch_operands = 0 : i64, tpu.core_type = #tpu.core_type<tc>, window_params = [{transform_indices = @transform_0, window_bounds = array<i64: 2, 128>}, {pipeline_mode = #tpu.pipeline_mode<synchronous>, transform_indices = @transform_1, window_bounds = array<i64: 32, 2>}, {pipeline_mode = #tpu.pipeline_mode<synchronous>, transform_indices = @transform_2, window_bounds = array<i64: 32, 1>}, {pipeline_mode = #tpu.pipeline_mode<synchronous>, transform_indices = @transform_3, window_bounds = array<i64: 32, 32>}, {pipeline_mode = #tpu.pipeline_mode<synchronous>, transform_indices = @transform_4, window_bounds = array<i64: 32, 1>}, {pipeline_mode = #tpu.pipeline_mode<synchronous>, transform_indices = @transform_5, window_bounds = array<i64: 32, 32>}, {pipeline_mode = #tpu.pipeline_mode<synchronous>, transform_indices = @transform_6, window_bounds = array<i64: 32, 1>}, {pipeline_mode = #tpu.pipeline_mode<synchronous>, transform_indices = @transform_7, window_bounds = array<i64: 32, 1>}, {pipeline_mode = #tpu.pipeline_mode<synchronous>, transform_indices = @transform_8, window_bounds = array<i64: 1, 1>}, {transform_indices = @transform_9, window_bounds = array<i64: 1, 128>}]} {
    %c0 = arith.constant 0 : index
    %c0_0 = arith.constant 0 : index
    %0 = vector.load %arg1[%c0, %c0_0] : memref<2x128xf32, #tpu.memory_space<vmem>>, vector<2x128xf32>
    %c0_1 = arith.constant 0 : index
    %c0_2 = arith.constant 0 : index
    %1 = vector.load %arg2[%c0_1, %c0_2] : memref<32x2xf32, #tpu.memory_space<vmem>>, vector<32x2xf32>
    %c0_3 = arith.constant 0 : index
    %c0_4 = arith.constant 0 : index
    %2 = vector.load %arg3[%c0_3, %c0_4] : memref<32x1xf32, #tpu.memory_space<vmem>>, vector<32x1xf32>
    %3 = vector.extract_strided_slice %1 {offsets = [0, 0], sizes = [32, 1], strides = [1, 1]} : vector<32x2xf32> to vector<32x1xf32>
    %4 = vector.extract_strided_slice %0 {offsets = [0, 0], sizes = [1, 128], strides = [1, 1]} : vector<2x128xf32> to vector<1x128xf32>
    %5 = vector.broadcast %3 : vector<32x1xf32> to vector<32x128xf32>
    %6 = vector.broadcast %4 : vector<1x128xf32> to vector<32x128xf32>
    %7 = arith.mulf %5, %6 : vector<32x128xf32>
    %8 = vector.broadcast %2 : vector<32x1xf32> to vector<32x128xf32>
    %9 = arith.addf %8, %7 : vector<32x128xf32>
    %10 = vector.extract_strided_slice %1 {offsets = [0, 1], sizes = [32, 1], strides = [1, 1]} : vector<32x2xf32> to vector<32x1xf32>
    %11 = vector.extract_strided_slice %0 {offsets = [1, 0], sizes = [1, 128], strides = [1, 1]} : vector<2x128xf32> to vector<1x128xf32>
    %12 = vector.broadcast %10 : vector<32x1xf32> to vector<32x128xf32>
    %13 = vector.broadcast %11 : vector<1x128xf32> to vector<32x128xf32>
    %14 = arith.mulf %12, %13 : vector<32x128xf32>
    %15 = arith.addf %9, %14 : vector<32x128xf32>
    %cst = arith.constant 0.000000e+00 : f32
    %16 = vector.broadcast %cst : f32 to vector<32x128xf32>
    %17 = arith.maximumf %15, %16 : vector<32x128xf32>
    %c0_5 = arith.constant 0 : index
    %c0_6 = arith.constant 0 : index
    %18 = vector.load %arg4[%c0_5, %c0_6] : memref<32x32xbf16, #tpu.memory_space<vmem>>, vector<32x32xbf16>
    %19 = arith.truncf %17 : vector<32x128xf32> to vector<32x128xbf16>
    %cst_7 = arith.constant dense<0.000000e+00> : vector<32x128xf32>
    %20 = tpu.matmul %18, %19, %cst_7 {dimension_numbers = #tpu.dot_dimension_numbers<[1], [0], [0], [1], [0, 0, 1, 1], [], []>} : vector<32x32xbf16>, vector<32x128xbf16>, vector<32x128xf32> -> vector<32x128xf32>
    %c0_8 = arith.constant 0 : index
    %c0_9 = arith.constant 0 : index
    %21 = vector.load %arg5[%c0_8, %c0_9] : memref<32x1xf32, #tpu.memory_space<vmem>>, vector<32x1xf32>
    %22 = vector.broadcast %21 : vector<32x1xf32> to vector<32x128xf32>
    %23 = arith.addf %20, %22 : vector<32x128xf32>
    %cst_10 = arith.constant 0.000000e+00 : f32
    %24 = vector.broadcast %cst_10 : f32 to vector<32x128xf32>
    %25 = arith.maximumf %23, %24 : vector<32x128xf32>
    %c0_11 = arith.constant 0 : index
    %c0_12 = arith.constant 0 : index
    %26 = vector.load %arg6[%c0_11, %c0_12] : memref<32x32xbf16, #tpu.memory_space<vmem>>, vector<32x32xbf16>
    %27 = arith.truncf %25 : vector<32x128xf32> to vector<32x128xbf16>
    %cst_13 = arith.constant dense<0.000000e+00> : vector<32x128xf32>
    %28 = tpu.matmul %26, %27, %cst_13 {dimension_numbers = #tpu.dot_dimension_numbers<[1], [0], [0], [1], [0, 0, 1, 1], [], []>} : vector<32x32xbf16>, vector<32x128xbf16>, vector<32x128xf32> -> vector<32x128xf32>
    %c0_14 = arith.constant 0 : index
    %c0_15 = arith.constant 0 : index
    %29 = vector.load %arg7[%c0_14, %c0_15] : memref<32x1xf32, #tpu.memory_space<vmem>>, vector<32x1xf32>
    %30 = vector.broadcast %29 : vector<32x1xf32> to vector<32x128xf32>
    %31 = arith.addf %28, %30 : vector<32x128xf32>
    %cst_16 = arith.constant 0.000000e+00 : f32
    %32 = vector.broadcast %cst_16 : f32 to vector<32x128xf32>
    %33 = arith.maximumf %31, %32 : vector<32x128xf32>
    %c0_17 = arith.constant 0 : index
    %c0_18 = arith.constant 0 : index
    %34 = vector.load %arg8[%c0_17, %c0_18] : memref<32x1xf32, #tpu.memory_space<vmem>>, vector<32x1xf32>
    %35 = vector.broadcast %34 : vector<32x1xf32> to vector<32x128xf32>
    %36 = arith.mulf %35, %33 : vector<32x128xf32>
    %cst_19 = arith.constant dense<0.000000e+00> : vector<128xf32>
    %37 = vector.multi_reduction <add>, %36, %cst_19 [0] : vector<32x128xf32> to vector<128xf32>
    %38 = vector.shape_cast %37 : vector<128xf32> to vector<1x128xf32>
    %c0_20 = arith.constant 0 : index
    %c0_21 = arith.constant 0 : index
    %39 = vector.load %arg9[%c0_20, %c0_21] : memref<1x1xf32, #tpu.memory_space<vmem>>, vector<1x1xf32>
    %40 = vector.broadcast %39 : vector<1x1xf32> to vector<1x128xf32>
    %41 = arith.addf %38, %40 : vector<1x128xf32>
    %c0_22 = arith.constant 0 : index
    %c0_23 = arith.constant 0 : index
    %42 = vector.load %arg10[%c0_22, %c0_23] : memref<1x128xf32, #tpu.memory_space<vmem>>, vector<1x128xf32>
    tpu.vector_store %arg10[%c0_22, %c0_23], %41 {strides = array<i32>} : memref<1x128xf32, #tpu.memory_space<vmem>>, vector<1x128xf32>,
    return
  }
  func.func @transform_0(%arg0: i32) -> (i32, i32) {
    %c0_i32 = arith.constant 0 : i32
    %c0_i32_0 = arith.constant 0 : i32
    return %c0_i32, %arg0 : i32, i32
  }
  func.func @transform_1(%arg0: i32) -> (i32, i32) {
    %c0_i32 = arith.constant 0 : i32
    %c0_i32_0 = arith.constant 0 : i32
    %c0_i32_1 = arith.constant 0 : i32
    return %c0_i32, %c0_i32_0 : i32, i32
  }
  func.func @transform_2(%arg0: i32) -> (i32, i32) {
    %c0_i32 = arith.constant 0 : i32
    %c0_i32_0 = arith.constant 0 : i32
    %c0_i32_1 = arith.constant 0 : i32
    return %c0_i32, %c0_i32_0 : i32, i32
  }
  func.func @transform_3(%arg0: i32) -> (i32, i32) {
    %c0_i32 = arith.constant 0 : i32
    %c0_i32_0 = arith.constant 0 : i32
    %c0_i32_1 = arith.constant 0 : i32
    return %c0_i32, %c0_i32_0 : i32, i32
  }
  func.func @transform_4(%arg0: i32) -> (i32, i32) {
    %c0_i32 = arith.constant 0 : i32
    %c0_i32_0 = arith.constant 0 : i32
    %c0_i32_1 = arith.constant 0 : i32
    return %c0_i32, %c0_i32_0 : i32, i32
  }
  func.func @transform_5(%arg0: i32) -> (i32, i32) {
    %c0_i32 = arith.constant 0 : i32
    %c0_i32_0 = arith.constant 0 : i32
    %c0_i32_1 = arith.constant 0 : i32
    return %c0_i32, %c0_i32_0 : i32, i32
  }
  func.func @transform_6(%arg0: i32) -> (i32, i32) {
    %c0_i32 = arith.constant 0 : i32
    %c0_i32_0 = arith.constant 0 : i32
    %c0_i32_1 = arith.constant 0 : i32
    return %c0_i32, %c0_i32_0 : i32, i32
  }
  func.func @transform_7(%arg0: i32) -> (i32, i32) {
    %c0_i32 = arith.constant 0 : i32
    %c0_i32_0 = arith.constant 0 : i32
    %c0_i32_1 = arith.constant 0 : i32
    return %c0_i32, %c0_i32_0 : i32, i32
  }
  func.func @transform_8(%arg0: i32) -> (i32, i32) {
    %c0_i32 = arith.constant 0 : i32
    %c0_i32_0 = arith.constant 0 : i32
    %c0_i32_1 = arith.constant 0 : i32
    return %c0_i32, %c0_i32_0 : i32, i32
  }
  func.func @transform_9(%arg0: i32) -> (i32, i32) {
    %c0_i32 = arith.constant 0 : i32
    %c0_i32_0 = arith.constant 0 : i32
    return %c0_i32, %arg0 : i32, i32
  }
}

</mosaic_0001>

<bundles_post_ra>
// kernel: discriminator_forward.1
= control target key start
LH: loop header
LB: loop body
LE: loop exit
PB: predicated region body
PF: predicated region fallthrough
CT: control target
= control target key end

     0   :  { %v426_v0 = vmov 0   ;;  %v427_v6 = vmov 1   ;;  %vm168_vm0 = vcmask 261120   ;;  %v64_v25 = vlaneseq  ;;  %s571_s2 = inlined_call_operand.vmem [shape: f32[32,1], index: 2, kind: input, shape index: {}]   ;;  %s572_s1 = inlined_call_operand.vmem [shape: f32[32,2], index: 1, kind: input, shape index: {}]   ;;  %s573_s3 = inlined_call_operand.vmem [shape: bf16[32,32], index: 3, kind: input, shape index: {}]   ;;  %s574_s4 = inlined_call_operand.vmem [shape: f32[32,1], index: 4, kind: input, shape index: {}]   ;;  %s575_s8 = inlined_call_operand.<no memory space> [shape: f32[1,1], index: 8, kind: input, shape index: {}]   ;;  %s576_s6 = inlined_call_operand.vmem [shape: f32[32,1], index: 6, kind: input, shape index: {}]   ;;  %s577_s7 = inlined_call_operand.vmem [shape: f32[32,1], index: 7, kind: input, shape index: {}]   ;;  %s578_s0 = inlined_call_operand.vmem [shape: f32[2,128], index: 0, kind: input, shape index: {}]   ;;  %s579_s5 = inlined_call_operand.vmem [shape: bf16[32,32], index: 5, kind: input, shape index: {}]   ;;  %s580_s9 = inlined_call_operand.vmem [shape: f32[1,128], index: 9, kind: output, shape index: {}]  }
   0x1   :  { %415 = vset.pattern.permute.xlu1 %v426_v0  ;;  %414 = vset.pattern.permute.xlu0 %v426_v0  ;;  %v40_v1 = vld [vmem:[%s571_s2] sm:$0xff]  ;;  %v41_v3 = vld [vmem:[%s571_s2 + $0x8] sm:$0xff]  ;;  %v39_v5 = vld [vmem:[%s572_s1 + $0x18] sm:$0xff]  ;;  %v14_v12 = vstv %s575_s8 }
   0x2   :  { %v36_v2 = vld [vmem:[%s572_s1] sm:$0xff]  ;;  %74 = vperm.xlu1 %415, %v40_v1   ;;  %v37_v4 = vld [vmem:[%s572_s1 + $0x8] sm:$0xff]  ;;  %v38_v7 = vld [vmem:[%s572_s1 + $0x10] sm:$0xff]  ;;  %15 = vst [vmem:[#allocation2] sm:$0x1] %v14_v12  ;;  %v545_v26 = vshrl.u32 %v64_v25, 7 }
   0x3   :  { %46 = vperm.xlu0 %414, %v36_v2   ;;  %v42_v8 = vld [vmem:[%s571_s2 + $0x10] sm:$0xff]  ;;  %v43_v9 = vld [vmem:[%s571_s2 + $0x18] sm:$0xff]  ;;  %v422_v10 = vld [vmem:[%s573_s3] sm:$0xff]  }
   0x4   :  { %400 = vmatprep.mubr.msk.bf16.mxu0 %vm168_vm0, %v422_v10  ;;  %v134_v11 = vld [vmem:[%s574_s4] sm:$0xff]  ;;  %v135_v13 = vld [vmem:[%s574_s4 + $0x8] sm:$0xff]  ;;  %v136_v14 = vld [vmem:[%s574_s4 + $0x10] sm:$0xff]  ;;  %v66_v29 = vsub.s32 0, %v545_v26  ;;  %v114_v30 = vsub.s32 1, %v545_v26 }
   0x5   :  { %v234_v15 = vld [vmem:[%s576_s6] sm:$0xff]  ;;  %v137_v16 = vld [vmem:[%s574_s4 + $0x18] sm:$0xff]  ;;  %v236_v17 = vld [vmem:[%s576_s6 + $0x10] sm:$0xff] }
   0x6   :  { %79 = vperm.xlu1 %415, %v41_v3   ;;  %v235_v18 = vld [vmem:[%s576_s6 + $0x8] sm:$0xff]  ;;  %v327_v19 = vld [vmem:[%s577_s7] sm:$0xff]  ;;  %v237_v20 = vld [vmem:[%s576_s6 + $0x18] sm:$0xff] }
   0x7   :  { %51 = vperm.xlu0 %414, %v37_v4   ;;  %v329_v21 = vld [vmem:[%s577_s7 + $0x10] sm:$0xff]  ;;  %v328_v22 = vld [vmem:[%s577_s7 + $0x8] sm:$0xff]  ;;  %v330_v24 = vld [vmem:[%s577_s7 + $0x18] sm:$0xff] }
   0x8   :  { %v35_v31 = vld [vmem:[%s578_s0] sm:$0x3] }
   0x9   :  { %v364_v23 = vld [vmem:[#allocation2] sm:$0x1]  ;;  %v67_v34 = vrot.slane %v35_v31, %v66_v29  ;;  %v115_v35 = vrot.slane %v35_v31, %v114_v30 }
   0xa   :  { %416 = vset.pattern.permute.xlu1 %v427_v6  ;;  %v424_v3 = vld [vmem:[%s579_s5] sm:$0xff]  }
   0xb   :  { %61 = vperm.xlu0 %414, %v39_v5   ;;  %101 = vperm.xlu1 %416, %v37_v4  }
   0xc   :  { %408 = vmatprep.mubr.msk.bf16.mxu1 %vm168_vm0, %v424_v3 }
   0xf   :  { %418 = vset.pattern.permute.xlu0 %v427_v6  ;;  %417 = vset.pattern.permute.xlu1 %v426_v0 }
  0x10   :  { %97 = vperm.xlu0 %418, %v36_v2   ;;  %56 = vperm.xlu1 %417, %v38_v7   ;;  %v423_v2 = vld [vmem:[%s573_s3 + $0x8] sm:$0xff]  }
  0x14   :  { %105 = vperm.xlu0 %418, %v38_v7   ;;  %84 = vperm.xlu1 %417, %v42_v8  }
  0x18   :  { %421 = vset.pattern.permute.xlu0 %v426_v0  ;;  %89 = vperm.xlu1 %417, %v43_v9  }
  0x19   :  { %145 = vperm.xlu0 %421, %v135_v13  }
  0x1c   :  { %419 = vset.pattern.permute.xlu1 %v427_v6 }
  0x1d   :  { %109 = vperm.xlu1 %419, %v39_v5   ;;  %240 = vperm.xlu0 %421, %v234_v15  }
  0x21   :  { %420 = vset.pattern.permute.xlu1 %v426_v0  ;;  %250 = vperm.xlu0 %421, %v236_v17  }
  0x22   :  { %140 = vperm.xlu1 %420, %v134_v11  }
  0x25   :  { %333 = vperm.xlu0 %421, %v327_v19  }
  0x26   :  { %150 = vperm.xlu1 %420, %v136_v14  }
  0x29   :  { %343 = vperm.xlu0 %421, %v329_v21  }
  0x2a   :  { %155 = vperm.xlu1 %420, %v137_v16  }
  0x2d   :  { %367 = vperm.xlu0 %421, %v364_v23  }
  0x2e   :  { %245 = vperm.xlu1 %420, %v235_v18  }
  0x32   :  { %255 = vperm.xlu1 %420, %v237_v20  }
  0x36   :  { %338 = vperm.xlu1 %420, %v328_v22   ;;  %v425_v22 = vld [vmem:[%s579_s5 + $0x8] sm:$0xff]  }
  0x3a   :  { %348 = vperm.xlu1 %420, %v330_v24  }
  0x81   :  { %v75_v27 = vpop.permute.xlu1 %74 }
  0x82   :  { %v47_v28 = vpop.permute.xlu0 %46 }
  0x83   :  { %v68_v39 = vmul.f32 %v67_v34, %v47_v28 }
  0x85   :  { %v80_v32 = vpop.permute.xlu1 %79  ;;  %v92_v43 = vadd.f32 %v75_v27, %v68_v39 }
  0x86   :  { %v52_v33 = vpop.permute.xlu0 %51 }
  0x87   :  { %v69_v36 = vmul.f32 %v67_v34, %v52_v33 }
  0x89   :  { %v93_v41 = vadd.f32 %v80_v32, %v69_v36 }
  0x8a   :  { %v62_v37 = vpop.permute.xlu0 %61  ;;  %v102_v38 = vpop.permute.xlu1 %101 }
  0x8b   :  { %v117_v40 = vmul.f32 %v115_v35, %v102_v38  ;;  %v71_v57 = vmul.f32 %v67_v34, %v62_v37 }
  0x8d   :  { %v121_v44 = vadd.f32 %v117_v40, %v93_v41 }
  0x8f   :  { %v98_v42 = vpop.permute.xlu0 %97  ;;  %v57_v46 = vpop.permute.xlu1 %56  ;;  %v125_v48 = vmax.f32 %v121_v44, 0.0 }
  0x90   :  { %v116_v45 = vmul.f32 %v115_v35, %v98_v42  ;;  %v70_v53 = vmul.f32 %v67_v34, %v57_v46 }
  0x92   :  { %v120_v47 = vadd.f32 %v116_v45, %v92_v43 }
  0x93   :  { %v85_v50 = vpop.permute.xlu1 %84  ;;  %v106_v52 = vpop.permute.xlu0 %105 }
  0x94   :  { %v124_v49 = vmax.f32 %v120_v47, 0.0  ;;  %v94_v55 = vadd.f32 %v85_v50, %v70_v53  ;;  %v118_v56 = vmul.f32 %v115_v35, %v106_v52 }
  0x96   :  { %v132_v51 = vpack.c.bf16 %v125_v48, %v124_v49  ;;  %v122_v59 = vadd.f32 %v118_v56, %v94_v55 }
  0x97   :  { %v90_v54 = vpop.permute.xlu1 %89 }
  0x98   :  { %396 = vmatprep.subr.bf16.mxu0 %v132_v51  ;;  %v95_v60 = vadd.f32 %v90_v54, %v71_v57  ;;  %v126_v63 = vmax.f32 %v122_v59, 0.0  ;;  %v146_v12 = vpop.permute.xlu0 %145 }
  0x99   :  { %397 = vmatpush3.bf16.msra.mxu0 %v132_v51 }
  0x9c   :  { %v110_v58 = vpop.permute.xlu1 %109  ;;  %v241_v23 = vpop.permute.xlu0 %240 }
  0x9d   :  { %v119_v61 = vmul.f32 %v115_v35, %v110_v58 }
  0x9f   :  { %v123_v62 = vadd.f32 %v119_v61, %v95_v60 }
  0xa0   :  { %v251_v25 = vpop.permute.xlu0 %250 }
  0xa1   :  { %v127_v0 = vmax.f32 %v123_v62, 0.0  ;;  %v141_v4 = vpop.permute.xlu1 %140 }
  0xa3   :  { %v133_v1 = vpack.c.bf16 %v127_v0, %v126_v63 }
  0xa4   :  { %v334_v34 = vpop.permute.xlu0 %333 }
  0xa5   :  { %398 = vmatprep.subr.bf16.mxu0 %v133_v1  ;;  %v151_v5 = vpop.permute.xlu1 %150 }
  0xa6   :  { %399 = vmatpush3.bf16.msra.mxu0 %v133_v1 }
  0xa8   :  { %v344_v45 = vpop.permute.xlu0 %343 }
  0xa9   :  { %401 = vmatmul.mubr.msk.bf16.vlgmr.msra.gmra.mrb[0].mxu0 %vm168_vm0, %v423_v2  ;;  %v156_v9 = vpop.permute.xlu1 %155 }
  0xac   :  { %v368_v56 = vpop.permute.xlu0 %367 }
  0xad   :  { %v246_v24 = vpop.permute.xlu1 %245  ;;  %v373_v58 = vrot.slane %v368_v56, %v66_v29 }
  0xb1   :  { %v256_v27 = vpop.permute.xlu1 %255 }
  0xb5   :  { %v339_v39 = vpop.permute.xlu1 %338 }
  0xb9   :  { %v349_v48 = vpop.permute.xlu1 %348 }
 0x17c   :  { %v402_v6 = vpop.f32.mrb[0].mxu0 }
 0x17d   :  { %v218_v7 = vadd.f32 %v402_v6, %v151_v5  ;;  %v209_v8 = vpop.f32.mrb[1].mxu0 }
 0x17e   :  { %v210_v10 = vadd.f32 %v209_v8, %v141_v4  ;;  %v403_v11 = vpop.f32.mrb[2].mxu0 }
 0x17f   :  { %v221_v13 = vadd.f32 %v403_v11, %v156_v9  ;;  %v212_v14 = vpop.f32.mrb[3].mxu0  ;;  %v226_v16 = vmax.f32 %v218_v7, 0.0 }
 0x180   :  { %v213_v15 = vadd.f32 %v212_v14, %v146_v12  ;;  %v224_v18 = vmax.f32 %v210_v10, 0.0 }
 0x181   :  { %v227_v17 = vmax.f32 %v221_v13, 0.0 }
 0x182   :  { %v225_v19 = vmax.f32 %v213_v15, 0.0 }
 0x183   :  { %v233_v20 = vpack.c.bf16 %v227_v17, %v226_v16 }
 0x184   :  { %v232_v21 = vpack.c.bf16 %v225_v19, %v224_v18 }
 0x186   :  { %404 = vmatprep.subr.bf16.mxu1 %v232_v21 }
 0x187   :  { %405 = vmatpush3.bf16.msra.mxu1 %v232_v21 }
 0x188   :  { %406 = vmatprep.subr.bf16.mxu1 %v233_v20 }
 0x18b   :  { %407 = vmatpush3.bf16.msra.mxu1 %v233_v20 }
 0x18e   :  { %409 = vmatmul.mubr.msk.bf16.vlgmr.msra.gmra.mrb[0].mxu1 %vm168_vm0, %v425_v22 }
 0x261   :  { %v410_v28 = vpop.f32.mrb[0].mxu1 }
 0x262   :  { %v308_v30 = vpop.f32.mrb[1].mxu1  ;;  %v317_v31 = vadd.f32 %v410_v28, %v251_v25 }
 0x263   :  { %v309_v32 = vadd.f32 %v308_v30, %v241_v23  ;;  %v411_v33 = vpop.f32.mrb[2].mxu1 }
 0x264   :  { %v311_v35 = vpop.f32.mrb[3].mxu1  ;;  %v320_v37 = vadd.f32 %v411_v33, %v256_v27  ;;  %v325_v40 = vmax.f32 %v317_v31, 0.0 }
 0x265   :  { %v323_v36 = vmax.f32 %v309_v32, 0.0  ;;  %v312_v38 = vadd.f32 %v311_v35, %v246_v24 }
 0x266   :  { %v326_v43 = vmax.f32 %v320_v37, 0.0  ;;  %v353_v46 = vmul.f32 %v344_v45, %v325_v40 }
 0x267   :  { %v324_v41 = vmax.f32 %v312_v38, 0.0  ;;  %v351_v42 = vmul.f32 %v334_v34, %v323_v36 }
 0x268   :  { %v354_v49 = vmul.f32 %v349_v48, %v326_v43 }
 0x269   :  { %v352_v44 = vmul.f32 %v339_v39, %v324_v41 }
 0x26b   :  { %v355_v47 = vadd.f32 %v352_v44, %v351_v42 }
 0x26d   :  { %v356_v50 = vadd.f32 %v355_v47, %v353_v46 }
 0x26f   :  { %v357_v51 = vadd.f32 %v356_v50, %v354_v49 }
 0x271   :  { %v358_v52 = vrot.slane %v357_v51, 4 }
 0x273   :  { %v359_v53 = vadd.f32 %v358_v52, %v357_v51 }
 0x275   :  { %v360_v54 = vrot.slane %v359_v53, 2 }
 0x277   :  { %v361_v55 = vadd.f32 %v360_v54, %v359_v53 }
 0x279   :  { %v362_v57 = vrot.slane %v361_v55, 1 }
 0x27b   :  { %v363_v59 = vadd.f32 %v362_v57, %v361_v55 }
 0x27d   :  { %v374_v60 = vadd.f32 %v373_v58, %v363_v59 }
 0x27f   :  { %375 = vst [vmem:[%s580_s9] sm:$0x1] %v374_v60 }

</bundles_post_ra>
